<compile_context>
chip_gen: v7x
topology: tpu7x:2x2x1
jax: 0.10.0
libtpu: 0.0.40
codegen_flags: <defaults>
</compile_context>

<pallas_src>
import math

import jax
import jax.numpy as jnp
from jax.experimental import pallas as pl
from jax.experimental.pallas import tpu as pltpu


def _round_up(x, m):
    return ((x + m - 1) // m) * m


def _pick_tile(total, max_tile, quantum):
    """Largest multiple of `quantum` that divides `total` and is <= max_tile
    (or `total` itself if total <= max_tile). `total` must be a multiple of quantum."""
    if total <= max_tile:
        return total
    t = max((max_tile // quantum) * quantum, quantum)
    while total % t:
        t -= quantum
    return t


def _pad2(a, target_shape):
    pads = [(0, t - s) for s, t in zip(a.shape, target_shape)]
    if all(p == (0, 0) for p in pads):
        return a
    return jnp.pad(a, pads)


def _gelu_exact(x):
    # torch nn.GELU() default (approximate='none'): 0.5*x*(1 + erf(x/sqrt(2)))
    return 0.5 * x * (1.0 + jax.lax.erf(x * (1.0 / math.sqrt(2.0))))


# ----------------------------- kernel 1: MLP + L2 normalize -----------------------------
def mlp_norm_kernel(x_ref, w1_ref, b1_ref, w2_ref, b2_ref, w3_ref, b3_ref, zn_ref):
    # bf16 MXU inputs, f32 accumulation, f32 biases / normalization.
    h = jnp.dot(x_ref[...], w1_ref[...], preferred_element_type=jnp.float32) + b1_ref[...]
    h = _gelu_exact(h).astype(w2_ref.dtype)
    h = jnp.dot(h, w2_ref[...], preferred_element_type=jnp.float32) + b2_ref[...]
    h = _gelu_exact(h).astype(w3_ref.dtype)
    z = jnp.dot(h, w3_ref[...], preferred_element_type=jnp.float32) + b3_ref[...]
    # F.normalize(z, dim=-1, p=2, eps=1e-12)  ==  z * rsqrt(max(sum(z^2), 1e-24))
    ss = jnp.sum(z * z, axis=-1, keepdims=True)
    zn_ref[...] = (z * jax.lax.rsqrt(jnp.maximum(ss, 1e-24))).astype(zn_ref.dtype)


# ------------------- kernel 2: last layer with fused weight-norm scaling -----------------
def last_layer_kernel(zn_ref, v_ref, s_ref, o_ref):
    acc = jnp.dot(zn_ref[...], v_ref[...], preferred_element_type=jnp.float32)
    o_ref[...] = (acc * s_ref[...]).astype(o_ref.dtype)


def dino_head_forward(x, params, *, compute_dtype=jnp.bfloat16, out_dtype=jnp.float32,
                      max_batch_tile=256, max_out_tile=4096, max_ll_batch_tile=512):
    (w1t, b1, w2t, b2, w3t, b3, g, vt) = params
    n, in_dim = x.shape
    hid = w1t.shape[1]
    bneck = w3t.shape[1]
    out_dim = vt.shape[1]

    # Padded sizes: feature dims -> multiples of 128 (lane-dense), batch -> multiple of 8.
    in_p = _round_up(in_dim, 128)
    hid_p = _round_up(hid, 128)
    bn_p = _round_up(bneck, 128)
    out_p = _round_up(out_dim, 128)
    n_p = _round_up(n, 8)

    # Tiles are divisors of the padded sizes -> no extra padding, no trailing big copy.
    tn1 = _pick_tile(n_p, max_batch_tile, 8)        # kernel-1 batch tile
    tn2 = _pick_tile(n_p, max_ll_batch_tile, 8)     # kernel-2 batch tile
    to = _pick_tile(out_p, max_out_tile, 128)       # kernel-2 out-dim tile

    f32 = jnp.float32
    xp = _pad2(x, (n_p, in_p)).astype(compute_dtype)
    w1p = _pad2(w1t, (in_p, hid_p)).astype(compute_dtype)
    w2p = _pad2(w2t, (hid_p, hid_p)).astype(compute_dtype)
    w3p = _pad2(w3t, (hid_p, bn_p)).astype(compute_dtype)
    b1p = _pad2(b1, (1, hid_p)).astype(f32)
    b2p = _pad2(b2, (1, hid_p)).astype(f32)
    b3p = _pad2(b3, (1, bn_p)).astype(f32)

    # Fused weight-norm: only the (1, out_dim) scale is computed here; w_eff is never
    # materialized.  Padded columns get scale 0 (and zero v), so they contribute 0.
    vnorm = jnp.sqrt(jnp.sum(vt.astype(f32) ** 2, axis=0, keepdims=True))
    scale = _pad2(g.astype(f32) / vnorm, (1, out_p))
    vp = _pad2(vt, (bn_p, out_p)).astype(compute_dtype)

    itm = jnp.dtype(compute_dtype).itemsize
    out_itm = jnp.dtype(out_dtype).itemsize

    # ---- kernel 1: grid over batch tiles; MLP weights/biases VMEM-resident (single-buffered) ----
    resident = pl.Buffered(1)   # constant block index -> no second buffer (v7x VMEM headroom)
    mlp_flops = 2 * n_p * (in_p * hid_p + hid_p * hid_p + hid_p * bn_p)
    mlp_bytes = ((n_p * in_p + in_p * hid_p + hid_p * hid_p + hid_p * bn_p
                  + n_p * bn_p) * itm + (2 * hid_p + bn_p) * 4)
    zn = pl.pallas_call(
        mlp_norm_kernel,
        out_shape=jax.ShapeDtypeStruct((n_p, bn_p), compute_dtype),
        grid_spec=pltpu.PrefetchScalarGridSpec(
            num_scalar_prefetch=0,
            grid=(n_p // tn1,),
            in_specs=[
                pl.BlockSpec((tn1, in_p), lambda i: (i, 0)),
                pl.BlockSpec((in_p, hid_p), lambda i: (0, 0), pipeline_mode=resident),
                pl.BlockSpec((1, hid_p), lambda i: (0, 0), pipeline_mode=resident),
                pl.BlockSpec((hid_p, hid_p), lambda i: (0, 0), pipeline_mode=resident),
                pl.BlockSpec((1, hid_p), lambda i: (0, 0), pipeline_mode=resident),
                pl.BlockSpec((hid_p, bn_p), lambda i: (0, 0), pipeline_mode=resident),
                pl.BlockSpec((1, bn_p), lambda i: (0, 0), pipeline_mode=resident),
            ],
            out_specs=pl.BlockSpec((tn1, bn_p), lambda i: (i, 0)),
        ),
        compiler_params=pltpu.CompilerParams(
            dimension_semantics=("parallel",),
            vmem_limit_bytes=48 * 1024 * 1024,
        ),
        cost_estimate=pl.CostEstimate(
            flops=mlp_flops, transcendentals=2 * n_p * hid_p, bytes_accessed=mlp_bytes),
    )(xp, w1p, b1p, w2p, b2p, w3p, b3p)

    # ---- kernel 2: (zn @ v) * scale; out-tile axis OUTER so each v tile streams from HBM once ----
    ll_flops = 2 * n_p * bn_p * out_p
    ll_bytes = (n_p * bn_p + bn_p * out_p) * itm + out_p * 4 + n_p * out_p * out_itm
    out_padded = pl.pallas_call(
        last_layer_kernel,
        out_shape=jax.ShapeDtypeStruct((n_p, out_p), out_dtype),
        grid_spec=pltpu.PrefetchScalarGridSpec(
            num_scalar_prefetch=0,
            grid=(out_p // to, n_p // tn2),
            in_specs=[
                pl.BlockSpec((tn2, bn_p), lambda j, i: (i, 0)),
                pl.BlockSpec((bn_p, to), lambda j, i: (0, j)),
                pl.BlockSpec((1, to), lambda j, i: (0, j)),
            ],
            out_specs=pl.BlockSpec((tn2, to), lambda j, i: (i, j)),
        ),
        compiler_params=pltpu.CompilerParams(
            dimension_semantics=("parallel", "parallel"),
            vmem_limit_bytes=48 * 1024 * 1024,
        ),
        cost_estimate=pl.CostEstimate(
            flops=ll_flops, transcendentals=0, bytes_accessed=ll_bytes),
    )(zn, vp, scale)

    if n_p == n and out_p == out_dim:
        return out_padded
    return out_padded[:n, :out_dim]


def make_params(key, in_dim, hidden_dim, bottleneck_dim, out_dim):
    # Synthetic init mirroring the module: trunc_normal(std=0.02)-like weights,
    # zero biases, weight_norm g filled with 1. Weights stored pre-transposed
    # as (in_features, out_features); v as (bottleneck_dim, out_dim).
    ks = jax.random.split(key, 4)
    std = 0.02
    w1t = jax.random.normal(ks[0], (in_dim, hidden_dim), jnp.float32) * std
    b1 = jnp.zeros((1, hidden_dim), jnp.float32)
    w2t = jax.random.normal(ks[1], (hidden_dim, hidden_dim), jnp.float32) * std
    b2 = jnp.zeros((1, hidden_dim), jnp.float32)
    w3t = jax.random.normal(ks[2], (hidden_dim, bottleneck_dim), jnp.float32) * std
    b3 = jnp.zeros((1, bottleneck_dim), jnp.float32)
    g = jnp.ones((1, out_dim), jnp.float32)
    vt = jax.random.normal(ks[3], (bottleneck_dim, out_dim), jnp.float32) * 0.1
    return (w1t, b1, w2t, b2, w3t, b3, g, vt)


def reference_forward(x, params):
    (w1t, b1, w2t, b2, w3t, b3, g, vt) = params
    h = _gelu_exact(x @ w1t + b1)
    h = _gelu_exact(h @ w2t + b2)
    z = h @ w3t + b3
    zn = z / jnp.maximum(jnp.sqrt(jnp.sum(z * z, axis=-1, keepdims=True)), 1e-12)
    vnorm = jnp.sqrt(jnp.sum(vt * vt, axis=0, keepdims=True))
    return zn @ (g * vt / vnorm)


if __name__ == "__main__":
    # Small shapes consistent with DINOHead(in_dim, out_dim, nlayers=3, ...).
    batch, in_dim, hidden_dim, bottleneck_dim, out_dim = 8, 32, 64, 32, 48

    key = jax.random.PRNGKey(0)
    kx, kp = jax.random.split(key)
    x = jax.random.normal(kx, (batch, in_dim), jnp.float32)
    params = make_params(kp, in_dim, hidden_dim, bottleneck_dim, out_dim)

    out = dino_head_forward(x, params)
    out = jax.block_until_ready(out)

    ref = reference_forward(x, params)
    assert out.shape == (batch, out_dim)
    # Kernel uses bf16 MXU inputs with f32 accumulation; compare against the f32
    # reference with a tolerance that covers bf16 input rounding.
    assert jnp.allclose(out, ref, atol=2e-2, rtol=2e-2), "mismatch vs JAX reference"

    print("KERNEL_OK")
</pallas_src>

<mosaic_0001>
module attributes {stable_mosaic.version = 11 : i64} {
  func.func @mlp_norm_kernel(%arg0: i32, %arg1: memref<8x128xbf16, #tpu.memory_space<vmem>>, %arg2: memref<128x128xbf16, #tpu.memory_space<vmem>>, %arg3: memref<1x128xf32, #tpu.memory_space<vmem>>, %arg4: memref<128x128xbf16, #tpu.memory_space<vmem>>, %arg5: memref<1x128xf32, #tpu.memory_space<vmem>>, %arg6: memref<128x128xbf16, #tpu.memory_space<vmem>>, %arg7: memref<1x128xf32, #tpu.memory_space<vmem>>, %arg8: memref<8x128xbf16, #tpu.memory_space<vmem>>) attributes {dimension_semantics = [#tpu.dimension_semantics<parallel>], iteration_bounds = array<i64: 1>, scalar_prefetch = 0 : i64, scratch_operands = 0 : i64, tpu.core_type = #tpu.core_type<tc>, window_params = [{transform_indices = @transform_0, window_bounds = array<i64: 8, 128>}, {pipeline_mode = #tpu.pipeline_mode<synchronous>, transform_indices = @transform_1, window_bounds = array<i64: 128, 128>}, {pipeline_mode = #tpu.pipeline_mode<synchronous>, transform_indices = @transform_2, window_bounds = array<i64: 1, 128>}, {pipeline_mode = #tpu.pipeline_mode<synchronous>, transform_indices = @transform_3, window_bounds = array<i64: 128, 128>}, {pipeline_mode = #tpu.pipeline_mode<synchronous>, transform_indices = @transform_4, window_bounds = array<i64: 1, 128>}, {pipeline_mode = #tpu.pipeline_mode<synchronous>, transform_indices = @transform_5, window_bounds = array<i64: 128, 128>}, {pipeline_mode = #tpu.pipeline_mode<synchronous>, transform_indices = @transform_6, window_bounds = array<i64: 1, 128>}, {transform_indices = @transform_7, window_bounds = array<i64: 8, 128>}]} {
    %c0 = arith.constant 0 : index
    %c0_0 = arith.constant 0 : index
    %0 = vector.load %arg1[%c0, %c0_0] : memref<8x128xbf16, #tpu.memory_space<vmem>>, vector<8x128xbf16>
    %c0_1 = arith.constant 0 : index
    %c0_2 = arith.constant 0 : index
    %1 = vector.load %arg2[%c0_1, %c0_2] : memref<128x128xbf16, #tpu.memory_space<vmem>>, vector<128x128xbf16>
    %cst = arith.constant dense<0.000000e+00> : vector<8x128xf32>
    %2 = tpu.matmul %0, %1, %cst {dimension_numbers = #tpu.dot_dimension_numbers<[1], [0], [0], [1], [0, 0, 1, 1], [], []>} : vector<8x128xbf16>, vector<128x128xbf16>, vector<8x128xf32> -> vector<8x128xf32>
    %c0_3 = arith.constant 0 : index
    %c0_4 = arith.constant 0 : index
    %3 = vector.load %arg3[%c0_3, %c0_4] : memref<1x128xf32, #tpu.memory_space<vmem>>, vector<1x128xf32>
    %4 = vector.broadcast %3 : vector<1x128xf32> to vector<8x128xf32>
    %5 = arith.addf %2, %4 : vector<8x128xf32>
    %cst_5 = arith.constant 5.000000e-01 : f32
    %6 = vector.broadcast %cst_5 : f32 to vector<8x128xf32>
    %7 = arith.mulf %6, %5 : vector<8x128xf32>
    %cst_6 = arith.constant 0.707106769 : f32
    %8 = vector.broadcast %cst_6 : f32 to vector<8x128xf32>
    %9 = arith.mulf %5, %8 : vector<8x128xf32>
    %10 = math.erf %9 : vector<8x128xf32>
    %cst_7 = arith.constant 1.000000e+00 : f32
    %11 = vector.broadcast %cst_7 : f32 to vector<8x128xf32>
    %12 = arith.addf %11, %10 : vector<8x128xf32>
    %13 = arith.mulf %7, %12 : vector<8x128xf32>
    %14 = arith.truncf %13 : vector<8x128xf32> to vector<8x128xbf16>
    %c0_8 = arith.constant 0 : index
    %c0_9 = arith.constant 0 : index
    %15 = vector.load %arg4[%c0_8, %c0_9] : memref<128x128xbf16, #tpu.memory_space<vmem>>, vector<128x128xbf16>
    %cst_10 = arith.constant dense<0.000000e+00> : vector<8x128xf32>
    %16 = tpu.matmul %14, %15, %cst_10 {dimension_numbers = #tpu.dot_dimension_numbers<[1], [0], [0], [1], [0, 0, 1, 1], [], []>} : vector<8x128xbf16>, vector<128x128xbf16>, vector<8x128xf32> -> vector<8x128xf32>
    %c0_11 = arith.constant 0 : index
    %c0_12 = arith.constant 0 : index
    %17 = vector.load %arg5[%c0_11, %c0_12] : memref<1x128xf32, #tpu.memory_space<vmem>>, vector<1x128xf32>
    %18 = vector.broadcast %17 : vector<1x128xf32> to vector<8x128xf32>
    %19 = arith.addf %16, %18 : vector<8x128xf32>
    %cst_13 = arith.constant 5.000000e-01 : f32
    %20 = vector.broadcast %cst_13 : f32 to vector<8x128xf32>
    %21 = arith.mulf %20, %19 : vector<8x128xf32>
    %cst_14 = arith.constant 0.707106769 : f32
    %22 = vector.broadcast %cst_14 : f32 to vector<8x128xf32>
    %23 = arith.mulf %19, %22 : vector<8x128xf32>
    %24 = math.erf %23 : vector<8x128xf32>
    %cst_15 = arith.constant 1.000000e+00 : f32
    %25 = vector.broadcast %cst_15 : f32 to vector<8x128xf32>
    %26 = arith.addf %25, %24 : vector<8x128xf32>
    %27 = arith.mulf %21, %26 : vector<8x128xf32>
    %28 = arith.truncf %27 : vector<8x128xf32> to vector<8x128xbf16>
    %c0_16 = arith.constant 0 : index
    %c0_17 = arith.constant 0 : index
    %29 = vector.load %arg6[%c0_16, %c0_17] : memref<128x128xbf16, #tpu.memory_space<vmem>>, vector<128x128xbf16>
    %cst_18 = arith.constant dense<0.000000e+00> : vector<8x128xf32>
    %30 = tpu.matmul %28, %29, %cst_18 {dimension_numbers = #tpu.dot_dimension_numbers<[1], [0], [0], [1], [0, 0, 1, 1], [], []>} : vector<8x128xbf16>, vector<128x128xbf16>, vector<8x128xf32> -> vector<8x128xf32>
    %c0_19 = arith.constant 0 : index
    %c0_20 = arith.constant 0 : index
    %31 = vector.load %arg7[%c0_19, %c0_20] : memref<1x128xf32, #tpu.memory_space<vmem>>, vector<1x128xf32>
    %32 = vector.broadcast %31 : vector<1x128xf32> to vector<8x128xf32>
    %33 = arith.addf %30, %32 : vector<8x128xf32>
    %34 = arith.mulf %33, %33 : vector<8x128xf32>
    %cst_21 = arith.constant dense<0.000000e+00> : vector<8xf32>
    %35 = vector.multi_reduction <add>, %34, %cst_21 [1] : vector<8x128xf32> to vector<8xf32>
    %36 = vector.shape_cast %35 : vector<8xf32> to vector<8x1xf32>
    %cst_22 = arith.constant 1.000000e-24 : f32
    %37 = vector.broadcast %cst_22 : f32 to vector<8x1xf32>
    %38 = arith.maximumf %36, %37 : vector<8x1xf32>
    %39 = math.rsqrt %38 : vector<8x1xf32>
    %40 = vector.broadcast %39 : vector<8x1xf32> to vector<8x128xf32>
    %41 = arith.mulf %33, %40 : vector<8x128xf32>
    %42 = arith.truncf %41 : vector<8x128xf32> to vector<8x128xbf16>
    %c0_23 = arith.constant 0 : index
    %c0_24 = arith.constant 0 : index
    %43 = vector.load %arg8[%c0_23, %c0_24] : memref<8x128xbf16, #tpu.memory_space<vmem>>, vector<8x128xbf16>
    tpu.vector_store %arg8[%c0_23, %c0_24], %42 {strides = array<i32>} : memref<8x128xbf16, #tpu.memory_space<vmem>>, vector<8x128xbf16>,
    return
  }
  func.func @transform_0(%arg0: i32) -> (i32, i32) {
    %c0_i32 = arith.constant 0 : i32
    %c0_i32_0 = arith.constant 0 : i32
    return %arg0, %c0_i32 : i32, i32
  }
  func.func @transform_1(%arg0: i32) -> (i32, i32) {
    %c0_i32 = arith.constant 0 : i32
    %c0_i32_0 = arith.constant 0 : i32
    %c0_i32_1 = arith.constant 0 : i32
    return %c0_i32, %c0_i32_0 : i32, i32
  }
  func.func @transform_2(%arg0: i32) -> (i32, i32) {
    %c0_i32 = arith.constant 0 : i32
    %c0_i32_0 = arith.constant 0 : i32
    %c0_i32_1 = arith.constant 0 : i32
    return %c0_i32, %c0_i32_0 : i32, i32
  }
  func.func @transform_3(%arg0: i32) -> (i32, i32) {
    %c0_i32 = arith.constant 0 : i32
    %c0_i32_0 = arith.constant 0 : i32
    %c0_i32_1 = arith.constant 0 : i32
    return %c0_i32, %c0_i32_0 : i32, i32
  }
  func.func @transform_4(%arg0: i32) -> (i32, i32) {
    %c0_i32 = arith.constant 0 : i32
    %c0_i32_0 = arith.constant 0 : i32
    %c0_i32_1 = arith.constant 0 : i32
    return %c0_i32, %c0_i32_0 : i32, i32
  }
  func.func @transform_5(%arg0: i32) -> (i32, i32) {
    %c0_i32 = arith.constant 0 : i32
    %c0_i32_0 = arith.constant 0 : i32
    %c0_i32_1 = arith.constant 0 : i32
    return %c0_i32, %c0_i32_0 : i32, i32
  }
  func.func @transform_6(%arg0: i32) -> (i32, i32) {
    %c0_i32 = arith.constant 0 : i32
    %c0_i32_0 = arith.constant 0 : i32
    %c0_i32_1 = arith.constant 0 : i32
    return %c0_i32, %c0_i32_0 : i32, i32
  }
  func.func @transform_7(%arg0: i32) -> (i32, i32) {
    %c0_i32 = arith.constant 0 : i32
    %c0_i32_0 = arith.constant 0 : i32
    return %arg0, %c0_i32 : i32, i32
  }
}

</mosaic_0001>

<bundles_post_ra>
// kernel: tpu_custom_call.1
= control target key start
LH: loop header
LB: loop body
LE: loop exit
PB: predicated region body
PF: predicated region fallthrough
CT: control target
= control target key end

     0   :  { %12 = vsyncpa [#allocation3], 0  ;;  %s880_s0 = inlined_call_operand.hbm [shape: bf16[8,128], index: 0, kind: input, shape index: {}]   ;;  %s881_s1 = inlined_call_operand.hbm [shape: bf16[128,128], index: 1, kind: input, shape index: {}]   ;;  %s882_s2 = inlined_call_operand.vmem [shape: f32[1,128], index: 2, kind: input, shape index: {}]   ;;  %s883_s3 = inlined_call_operand.hbm [shape: bf16[128,128], index: 3, kind: input, shape index: {}]   ;;  %s884_s4 = inlined_call_operand.vmem [shape: f32[1,128], index: 4, kind: input, shape index: {}]   ;;  %s885_s5 = inlined_call_operand.hbm [shape: bf16[128,128], index: 5, kind: input, shape index: {}]   ;;  %s886_s6 = inlined_call_operand.vmem [shape: f32[1,128], index: 6, kind: input, shape index: {}]   ;;  %s887_s7 = inlined_call_operand.hbm [shape: bf16[8,128], index: 7, kind: output, shape index: {}]  }
   0x1   :  { %13 = vsyncpa [#allocation6], 0 }
   0x2   :  { %14 = vsyncpa [#allocation9], 0 }
   0x3   :  { %15 = vsyncpa [#allocation4], 0  ;;  %s723_s24 = smov [#allocation5]   ;;  %s605_s28 = scalar_lea.hbm %s881_s1, 1024 }
   0x4   :  { %s31_s25 = sshll.u32 %s723_s24, 4  ;;  %p606_p0 = scmp.ne.s32.totalorder %s881_s1, %s605_s28  ;;  %s32_s25 = int_to_ptr.vmem [resolvable:$true] %s31_s25 }
   0x5   :  { %p609_p1 = scmp.lt.u32.totalorder %s605_s28, %s881_s1 }
   0x7   :  { %p611_p2 = pnand %p609_p1, %p606_p0 }
   0x9   :  { %614 = shalt.err (!%p611_p2)
}
   0xa   :  { %s615_s10 = scalar_lea.vmem %s32_s25, 1024  ;;  %p620_p4 = scmp.lt.s32.totalorder %s32_s25, %s32_s25 }
   0xb   :  { %p616_p3 = scmp.ne.s32.totalorder %s32_s25, %s615_s10  ;;  %p621_p5 = scmp.lt.s32.totalorder %s615_s10, %s615_s10 }
   0xd   :  { %p622_p6 = por %p621_p5, %p620_p4 }
   0xf   :  { %p623_p7 = pnand %p622_p6, %p616_p3 }
  0x11   :  { %626 = shalt.err (!%p623_p7)
}
  0x12   :  { %s724_s11 = smov 64   ;;  %s725_s12 = smov 4  }
  0x13   :  { %37 = dma.hbm_to_vmem [thread:$0]  %s881_s1, 1024, %s32_s25, [#allocation6], %s724_s11, %s724_s11, %s725_s12  }
  0x14   :  { %s726_s15 = smov [#allocation2]   ;;  %s727_s17 = smov [#allocation7]  }
  0x15   :  { %s22_s16 = sshll.u32 %s726_s15, 4  ;;  %s45_s18 = sshll.u32 %s727_s17, 4  ;;  %s23_s16 = int_to_ptr.vmem [resolvable:$true] %s22_s16  ;;  %s46_s18 = int_to_ptr.vmem [resolvable:$true] %s45_s18 }
  0x16   :  { %s627_s21 = scalar_lea.hbm %s880_s0, 64 }
  0x17   :  { %p628_p8 = scmp.ne.s32.totalorder %s880_s0, %s627_s21  ;;  %p631_p9 = scmp.lt.u32.totalorder %s627_s21, %s880_s0 }
  0x19   :  { %p633_p10 = pnand %p631_p9, %p628_p8 }
  0x1b   :  { %636 = shalt.err (!%p633_p10)
}
  0x1c   :  { %s637_s1 = scalar_lea.vmem %s23_s16, 64  ;;  %p642_p12 = scmp.lt.s32.totalorder %s23_s16, %s23_s16 }
  0x1d   :  { %p638_p11 = scmp.ne.s32.totalorder %s23_s16, %s637_s1  ;;  %p643_p13 = scmp.lt.s32.totalorder %s637_s1, %s637_s1 }
  0x1f   :  { %p644_p0 = por %p643_p13, %p642_p12 }
  0x21   :  { %p645_p1 = pnand %p644_p0, %p638_p11 }
  0x23   :  { %648 = shalt.err (!%p645_p1)
}
  0x24   :  { %25 = dma.hbm_to_vmem [thread:$0]  %s880_s0, 64, %s23_s16, [#allocation3]  }
  0x25   :  { %s649_s30 = scalar_lea.hbm %s883_s3, 1024 }
  0x26   :  { %p650_p2 = scmp.ne.s32.totalorder %s883_s3, %s649_s30  ;;  %p653_p3 = scmp.lt.u32.totalorder %s649_s30, %s883_s3 }
  0x28   :  { %p655_p4 = pnand %p653_p3, %p650_p2 }
  0x2a   :  { %658 = shalt.err (!%p655_p4)
}
  0x2b   :  { %s659_s14 = scalar_lea.vmem %s46_s18, 1024  ;;  %p664_p6 = scmp.lt.s32.totalorder %s46_s18, %s46_s18 }
  0x2c   :  { %p660_p5 = scmp.ne.s32.totalorder %s46_s18, %s659_s14  ;;  %p665_p7 = scmp.lt.s32.totalorder %s659_s14, %s659_s14 }
  0x2e   :  { %p666_p8 = por %p665_p7, %p664_p6 }
  0x30   :  { %p667_p9 = pnand %p666_p8, %p660_p5 }
  0x32   :  { %670 = shalt.err (!%p667_p9)
}
  0x33   :  { %51 = dma.hbm_to_vmem [thread:$0]  %s883_s3, 1024, %s46_s18, [#allocation6], %s724_s11, %s724_s11, %s725_s12  }
  0x34   :  { %s728_s16 = smov [#allocation8]   ;;  %s671_s21 = scalar_lea.hbm %s885_s5, 1024 }
  0x35   :  { %s59_s17 = sshll.u32 %s728_s16, 4  ;;  %p672_p10 = scmp.ne.s32.totalorder %s885_s5, %s671_s21  ;;  %s60_s17 = int_to_ptr.vmem [resolvable:$true] %s59_s17 }
  0x36   :  { %p675_p11 = scmp.lt.u32.totalorder %s671_s21, %s885_s5 }
  0x38   :  { %p677_p12 = pnand %p675_p11, %p672_p10 }
  0x3a   :  { %680 = shalt.err (!%p677_p12)
}
  0x3b   :  { %s681_s1 = scalar_lea.vmem %s60_s17, 1024  ;;  %p686_p0 = scmp.lt.s32.totalorder %s60_s17, %s60_s17 }
  0x3c   :  { %p682_p13 = scmp.ne.s32.totalorder %s60_s17, %s681_s1  ;;  %p687_p1 = scmp.lt.s32.totalorder %s681_s1, %s681_s1 }
  0x3e   :  { %p688_p2 = por %p687_p1, %p686_p0 }
  0x40   :  { %p689_p3 = pnand %p688_p2, %p682_p13 }
  0x42   :  { %692 = shalt.err (!%p689_p3)
}
  0x43   :  { %65 = dma.hbm_to_vmem [thread:$0]  %s885_s5, 1024, %s60_s17, [#allocation9], %s724_s11, %s724_s11, %s725_s12  }
  0x44   :  { %715 = dma.done.wait [#allocation3], 64  }
  0x45   :  { %716 = vsyncadd [#allocation3], 4294967232 }
  0x46   :  { %717 = dma.done.wait [#allocation6], 2048  }
  0x47   :  { %718 = vsyncadd [#allocation6], 4294965248 }
  0x48   :  { %719 = dma.done.wait [#allocation9], 1024  }
  0x49   :  { %720 = vsyncadd [#allocation9], 4294966272  ;;  %v729_v0 = vmov 0.0   ;;  %vm730_vm0 = vmmov 0   ;;  %v575_v1 = vld [vmem:[#allocation5] sm:$0xff]   ;;  %v576_v2 = vld [vmem:[#allocation5 + $0x8] sm:$0xff]  }
  0x4a   :  { %506 = vmatprep.subr.bf16.mxu0 %v729_v0  ;;  %522 = vmatprep.mubr.msk.bf16.mxu0 %vm730_vm0, %v729_v0  ;;  %v577_v3 = vld [vmem:[#allocation5 + $0x10] sm:$0xff]   ;;  %v583_v4 = vld [vmem:[#allocation7] sm:$0xff]   ;;  %v578_v5 = vld [vmem:[#allocation5 + $0x18] sm:$0xff]  }
  0x4b   :  { %526 = vmatprep.subr.bf16.mxu1 %v729_v0  ;;  %542 = vmatprep.mubr.msk.bf16.mxu1 %vm730_vm0, %v729_v0  ;;  %v584_v6 = vld [vmem:[#allocation7 + $0x8] sm:$0xff]   ;;  %v579_v7 = vld [vmem:[#allocation5 + $0x20] sm:$0xff]   ;;  %v585_v8 = vld [vmem:[#allocation7 + $0x10] sm:$0xff]  }
  0x4c   :  { %507 = vmatpush3.bf16.msra.mxu0 %v575_v1  ;;  %527 = vmatpush3.bf16.msra.mxu1 %v583_v4  ;;  %v580_v9 = vld [vmem:[#allocation5 + $0x28] sm:$0xff]   ;;  %v581_v10 = vld [vmem:[#allocation5 + $0x30] sm:$0xff]   ;;  %v582_v11 = vld [vmem:[#allocation5 + $0x38] sm:$0xff]  }
  0x4d   :  { %508 = vmatprep.subr.bf16.mxu0 %v729_v0  ;;  %528 = vmatprep.subr.bf16.mxu1 %v729_v0  ;;  %v81_v12 = vld [vmem:[#allocation2] sm:$0xf]  ;;  %v587_v14 = vld [vmem:[#allocation7 + $0x20] sm:$0xff]   ;;  %v588_v15 = vld [vmem:[#allocation7 + $0x28] sm:$0xff]  }
  0x4e   :  { %v586_v13 = vld [vmem:[#allocation7 + $0x18] sm:$0xff]   ;;  %v589_v16 = vld [vmem:[#allocation7 + $0x30] sm:$0xff]   ;;  %v591_v18 = vld [vmem:[#allocation8] sm:$0xff]  }
  0x4f   :  { %v590_v17 = vld [vmem:[#allocation7 + $0x38] sm:$0xff]   ;;  %v592_v19 = vld [vmem:[#allocation8 + $0x8] sm:$0xff]   ;;  %v593_v20 = vld [vmem:[#allocation8 + $0x10] sm:$0xff]  }
  0x50   :  { %509 = vmatpush3.bf16.msra.mxu0 %v576_v2  ;;  %529 = vmatpush3.bf16.msra.mxu1 %v584_v6  ;;  %v452_v21 = vld [vmem:[%s882_s2] ss:$0 sm:$0xff]  ;;  %v595_v34 = vld [vmem:[#allocation8 + $0x20] sm:$0xff]   ;;  %v596_v35 = vld [vmem:[#allocation8 + $0x28] sm:$0xff]  }
  0x51   :  { %510 = vmatprep.subr.bf16.mxu0 %v729_v0  ;;  %530 = vmatprep.subr.bf16.mxu1 %v729_v0  ;;  %v594_v33 = vld [vmem:[#allocation8 + $0x18] sm:$0xff]   ;;  %v597_v36 = vld [vmem:[#allocation8 + $0x30] sm:$0xff]  }
  0x52   :  { %v598_v37 = vld [vmem:[#allocation8 + $0x38] sm:$0xff]  }
  0x53   :  { %v461_v38 = vld [vmem:[%s884_s4] ss:$0 sm:$0xff]  ;;  %s731_s4 = smov [#allocation10]  }
  0x54   :  { %511 = vmatpush3.bf16.msra.mxu0 %v577_v3  ;;  %531 = vmatpush3.bf16.msra.mxu1 %v585_v8  ;;  %v470_v50 = vld [vmem:[%s886_s6] ss:$0 sm:$0xff]  ;;  %s441_s28 = sshll.u32 %s731_s4, 4  ;;  %s442_s28 = int_to_ptr.vmem [resolvable:$true] %s441_s28 }
  0x55   :  { %512 = vmatprep.subr.bf16.mxu0 %v729_v0  ;;  %532 = vmatprep.subr.bf16.mxu1 %v729_v0  ;;  %s693_s29 = scalar_lea.vmem %s442_s28, 64  ;;  %p698_p5 = scmp.lt.s32.totalorder %s442_s28, %s442_s28 }
  0x56   :  { %p694_p4 = scmp.ne.s32.totalorder %s442_s28, %s693_s29  ;;  %p699_p6 = scmp.lt.s32.totalorder %s693_s29, %s693_s29 }
  0x58   :  { %513 = vmatpush3.bf16.msra.mxu0 %v578_v5  ;;  %533 = vmatpush3.bf16.msra.mxu1 %v586_v13  ;;  %p700_p7 = por %p699_p6, %p698_p5 }
  0x59   :  { %514 = vmatprep.subr.bf16.mxu0 %v729_v0  ;;  %534 = vmatprep.subr.bf16.mxu1 %v729_v0 }
  0x5a   :  { %p701_p8 = pnand %p700_p7, %p694_p4 }
  0x5c   :  { %515 = vmatpush3.bf16.msra.mxu0 %v579_v7  ;;  %535 = vmatpush3.bf16.msra.mxu1 %v587_v14 }
  0x5d   :  { %516 = vmatprep.subr.bf16.mxu0 %v729_v0  ;;  %536 = vmatprep.subr.bf16.mxu1 %v729_v0 }
  0x60   :  { %517 = vmatpush3.bf16.msra.mxu0 %v580_v9  ;;  %537 = vmatpush3.bf16.msra.mxu1 %v588_v15 }
  0x61   :  { %518 = vmatprep.subr.bf16.mxu0 %v729_v0  ;;  %538 = vmatprep.subr.bf16.mxu1 %v729_v0 }
  0x64   :  { %519 = vmatpush3.bf16.msra.mxu0 %v581_v10  ;;  %539 = vmatpush3.bf16.msra.mxu1 %v589_v16 }
  0x65   :  { %520 = vmatprep.subr.bf16.mxu0 %v729_v0  ;;  %540 = vmatprep.subr.bf16.mxu1 %v729_v0 }
  0x68   :  { %521 = vmatpush3.bf16.msra.mxu0 %v582_v11  ;;  %541 = vmatpush3.bf16.msra.mxu1 %v590_v17 }
  0x69   :  { %546 = vmatprep.subr.bf16.mxu0 %v729_v0 }
  0x6b   :  { %523 = vmatmul.mubr.bf16.vlgmr.msra.gmra.mrb[0].mxu0 %v81_v12 }
  0x6c   :  { %562 = vmatprep.mubr.msk.bf16.mxu0 %vm730_vm0, %v729_v0  ;;  %547 = vmatpush3.bf16.msra.mxu0 %v591_v18 }
  0x6d   :  { %548 = vmatprep.subr.bf16.mxu0 %v729_v0 }
  0x70   :  { %549 = vmatpush3.bf16.msra.mxu0 %v592_v19 }
  0x71   :  { %550 = vmatprep.subr.bf16.mxu0 %v729_v0 }
  0x74   :  { %551 = vmatpush3.bf16.msra.mxu0 %v593_v20 }
  0x75   :  { %552 = vmatprep.subr.bf16.mxu0 %v729_v0 }
  0x78   :  { %553 = vmatpush3.bf16.msra.mxu0 %v594_v33 }
  0x79   :  { %554 = vmatprep.subr.bf16.mxu0 %v729_v0 }
  0x7c   :  { %555 = vmatpush3.bf16.msra.mxu0 %v595_v34 }
  0x7d   :  { %556 = vmatprep.subr.bf16.mxu0 %v729_v0 }
  0x80   :  { %557 = vmatpush3.bf16.msra.mxu0 %v596_v35 }
  0x81   :  { %558 = vmatprep.subr.bf16.mxu0 %v729_v0 }
  0x84   :  { %559 = vmatpush3.bf16.msra.mxu0 %v597_v36 }
  0x85   :  { %560 = vmatprep.subr.bf16.mxu0 %v729_v0 }
  0x88   :  { %561 = vmatpush3.bf16.msra.mxu0 %v598_v37 }
 0x13e   :  { %v187_v22 = vpop.f32.mrb[0].mxu0 }
 0x13f   :  { %v188_v23 = vadd.f32 %v452_v21, %v187_v22  ;;  %v524_v24 = vpop.f32.mrb[1].mxu0 }
 0x140   :  { %v190_v25 = vpop.f32.mrb[2].mxu0 }
 0x141   :  { %v194_v26 = vmul.f32 0.70710677, %v188_v23  ;;  %v525_v27 = vpop.f32.mrb[3].mxu0  ;;  %v193_v29 = vmul.f32 0.5, %v188_v23 }
 0x143   :  { %599 = verf.f32 %v194_v26 }
 0x14d   :  { %v600_v28 = vpop.eup %599 }
 0x14e   :  { %v196_v30 = vadd.f32 1.0, %v600_v28 }
 0x150   :  { %v197_v31 = vmul.f32 %v196_v30, %v193_v29 }
 0x152   :  { %v198_v32 = vpack.c.bf16 %v197_v31, %v197_v31 }
 0x154   :  { %543 = vmatmul.mubr.bf16.vlgmr.msra.gmra.mrb[0].mxu1 %v198_v32 }
 0x227   :  { %v304_v39 = vpop.f32.mrb[0].mxu1 }
 0x228   :  { %v305_v40 = vadd.f32 %v461_v38, %v304_v39  ;;  %v544_v41 = vpop.f32.mrb[1].mxu1 }
 0x229   :  { %v307_v42 = vpop.f32.mrb[2].mxu1 }
 0x22a   :  { %v311_v43 = vmul.f32 0.70710677, %v305_v40  ;;  %v545_v44 = vpop.f32.mrb[3].mxu1  ;;  %v310_v46 = vmul.f32 0.5, %v305_v40 }
 0x22c   :  { %601 = verf.f32 %v311_v43 }
 0x236   :  { %v602_v45 = vpop.eup %601 }
 0x237   :  { %v313_v47 = vadd.f32 1.0, %v602_v45 }
 0x239   :  { %v314_v48 = vmul.f32 %v313_v47, %v310_v46 }
 0x23b   :  { %v315_v49 = vpack.c.bf16 %v314_v48, %v314_v48 }
 0x23d   :  { %563 = vmatmul.mubr.bf16.vlgmr.msra.gmra.mrb[4].mxu0 %v315_v49 }
 0x310   :  { %v421_v51 = vpop.f32.mrb[4].mxu0 }
 0x311   :  { %v422_v52 = vadd.f32 %v470_v50, %v421_v51  ;;  %v564_v53 = vpop.f32.mrb[5].mxu0 }
 0x312   :  { %v424_v54 = vpop.f32.mrb[6].mxu0 }
 0x313   :  { %v565_v55 = vpop.f32.mrb[7].mxu0  ;;  %v427_v56 = vmul.f32 %v422_v52, %v422_v52 }
 0x315   :  { %428 = vadd.xlane.f32.xlu0 %v427_v56 }
 0x3a2   :  { %v429_v57 = vpop.xlane.xlu0 %428 }
 0x3a3   :  { %v430_v58 = vmax.f32 %v429_v57, 1e-24 }
 0x3a5   :  { %603 = vrsqrt.f32 %v430_v58 }
 0x3af   :  { %v604_v59 = vpop.eup %603 }
 0x3b0   :  { %v432_v60 = vmul.f32 %v604_v59, %v422_v52 }
 0x3b2   :  { %v433_v61 = vpack.c.bf16 %v432_v60, %v432_v60 }
 0x3b4   :  { %434 = vst [vmem:[#allocation10] sm:$0xf] %v433_v61 }
 0x3b5   :  { %704 = shalt.err (!%p701_p8)
}
 0x3b6   :  { %s705_s8 = scalar_lea.hbm %s887_s7, 64 }
 0x3b7   :  { %p706_p9 = scmp.ne.s32.totalorder %s887_s7, %s705_s8  ;;  %p709_p10 = scmp.lt.u32.totalorder %s705_s8, %s887_s7 }
 0x3b9   :  { %p711_p11 = pnand %p709_p10, %p706_p9 }
 0x3bb   :  { %714 = shalt.err (!%p711_p11)
}
 0x3bc   :  { %444 = dma.vmem_to_hbm [thread:$0]  %s442_s28, 64, %s887_s7, [#allocation4]  }
 0x3bd   :  { %721 = dma.done.wait [#allocation4], 64  }
 0x3be   :  { %722 = vsyncadd [#allocation4], 4294967232 }
 0x3bf   :  { %448 = vsyncpa [#allocation3], 1 }
 0x3c0   :  { %449 = vsyncpa [#allocation6], 1 }
 0x3c1   :  { %450 = vsyncpa [#allocation9], 1 }
 0x3c2   :  { %451 = vsyncpa [#allocation4], 1 }

</bundles_post_ra>
